<compile_context>
chip_gen: v7x
topology: tpu7x:2x2x1
jax: 0.10.0
libtpu: 0.0.40
codegen_flags: <defaults>
</compile_context>

<pallas_src>
import functools

import jax
import jax.numpy as jnp
import numpy as np
from jax import lax
from jax.experimental import pallas as pl
from jax.experimental.pallas import tpu as pltpu

_LANE = 128     # lane width (last dim)
_SUBLANE = 8    # f32 sublane width (second-to-last dim)


def _round_up(n, m):
    return ((n + m - 1) // m) * m


# ------------------------------ Pallas kernel --------------------------------
def _fused_chain_kernel(x_ref, *refs, thetas, num_cores, T, use_leq,
                        if_chunk, unroll):
    """Fused chain of neuromorphic cores for one batch tile.

    x_ref      : VMEM (TB, A0p)      time-mean of the input spike train (== x)
    refs[:n]   : VMEM (Ap_i, Op_i)   per-core weights, pre-transposed (A, O),
                                     zero padded to 128-lane multiples
    refs[n]    : VMEM (TB, Op_last)  output: osum of the last core's ideal spikes
    thetas     : static tuple of per-core firing thresholds
    """
    w_refs = refs[:num_cores]
    out_ref = refs[num_cores]
    inv_T = jnp.float32(1.0 / T)

    sbar = x_ref[...]                                    # (TB, A0p) time-mean input
    for c in range(num_cores):
        # avg_values == (mean_t S) @ W^T ; weight is stored as (A,O) so this is
        # a straight MXU matmul with no transpose. Zero-padded lanes/rows
        # contribute exactly zero downstream.
        v = jnp.dot(sbar, w_refs[c][...],
                    preferred_element_type=jnp.float32)            # (TB, Op)
        theta = jnp.float32(thetas[c])                             # scalar splat
        is_last = (c == num_cores - 1)
        o_p = v.shape[1]
        cw = min(o_p, if_chunk)                                    # multiple of 128

        # Register-blocked integrate-fire: per lane-chunk carries stay resident
        # in vregs across all T steps instead of spilling full-tile carries.
        chunks = []
        for c0 in range(0, o_p, cw):
            w_cols = min(cw, o_p - c0)
            vc = v[:, c0:c0 + w_cols]

            def if_body(_, carry, vc=vc, theta=theta):
                m, osum = carry
                m = m + vc                                         # integrate
                fired = (theta <= m) if use_leq else (theta < m)   # scalar theta
                spk = fired.astype(jnp.float32)
                return m - theta * spk, osum + spk                 # reset, count

            _, osum_c = lax.fori_loop(
                0, T, if_body, (jnp.zeros_like(vc), jnp.zeros_like(vc)),
                unroll=unroll)

            if is_last:
                out_ref[:, c0:c0 + w_cols] = osum_c                # lane-dense store
            else:
                chunks.append(osum_c)

        if not is_last:
            osum = chunks[0] if len(chunks) == 1 else jnp.concatenate(chunks, -1)
            # Chain on time-averaged activity; stays on-chip, never hits HBM.
            sbar = osum * inv_T


# ------------------------------- host wrapper ---------------------------------
class CoreChainRunner:
    """Pads/transposes the per-core weights ONCE and exposes a jitted forward
    that maps a flattened analog input (B, A0) -> osum of the last core."""

    def __init__(self, weights, thresholds, simulation_length,
                 thresholding_mode="<", max_batch_tile=256, if_chunk_lanes=512):
        assert thresholding_mode in ("<", "<=")
        assert max_batch_tile % _SUBLANE == 0
        assert if_chunk_lanes % _LANE == 0
        self.n = len(weights)
        self.T = int(simulation_length)
        self.use_leq = (thresholding_mode == "<=")
        self.max_batch_tile = int(max_batch_tile)
        self.if_chunk = int(if_chunk_lanes)
        # full unroll only for short spike loops; partial otherwise (vreg/i-cache)
        self.unroll = True if self.T <= 8 else 4
        self.thetas = tuple(float(t) for t in thresholds)
        # Note: theta <= 0 makes padded lanes fire every cycle. Still correct
        # (padded weight rows are zero, padded columns are sliced off), just
        # wasted VPU work.

        # Pre-pad + pre-transpose weights once (not per forward call).
        self.a0 = int(weights[0].shape[1])
        self.a0_pad = _round_up(self.a0, _LANE)
        prev_o_pad = self.a0_pad
        w_padded, o_pads = [], []
        for w in weights:
            O, A = int(w.shape[0]), int(w.shape[1])
            assert A <= prev_o_pad, \
                "core axon count must fit the previous core's padded width"
            o_pad = _round_up(O, _LANE)
            wp = jnp.zeros((prev_o_pad, o_pad), jnp.float32).at[:A, :O].set(
                jnp.asarray(w, jnp.float32).T)          # pre-transposed (A, O)
            w_padded.append(wp)
            o_pads.append(o_pad)
            prev_o_pad = o_pad
        self.w_padded = tuple(w_padded)
        self.o_pads = tuple(o_pads)
        self.o_last = int(weights[-1].shape[0])
        self._forward = jax.jit(self._forward_impl)

    def _forward_impl(self, xf, *w_padded):
        B, A0 = xf.shape
        assert A0 == self.a0
        # Batch tile: multiple of 8 sublanes, up to max_batch_tile (MXU-sized).
        tb = _round_up(min(self.max_batch_tile, _round_up(B, _SUBLANE)), _SUBLANE)
        b_pad = _round_up(B, tb)
        grid = (b_pad // tb,)

        x_pad = jnp.zeros((b_pad, self.a0_pad), jnp.float32).at[:B, :A0].set(
            xf.astype(jnp.float32))

        in_specs = [pl.BlockSpec((tb, self.a0_pad), lambda i: (i, 0))]
        for wp in w_padded:
            # Constant block index -> the weight block is fetched once and
            # stays resident across all batch tiles.
            in_specs.append(pl.BlockSpec(wp.shape, lambda i: (0, 0)))
        out_specs = pl.BlockSpec((tb, self.o_pads[-1]), lambda i: (i, 0))

        # VMEM budget: double-buffered x/out tiles + weights + IF intermediates.
        needed = 2 * 4 * tb * self.a0_pad + 2 * 4 * tb * self.o_pads[-1]
        for wp in w_padded:
            needed += 2 * 4 * int(np.prod(wp.shape))
        needed += 4 * 4 * tb * max(self.o_pads + (self.a0_pad,))
        vmem_limit = int(min(max(needed + (8 << 20), 32 << 20), 64 << 20))

        kernel = functools.partial(
            _fused_chain_kernel, thetas=self.thetas, num_cores=self.n,
            T=self.T, use_leq=self.use_leq, if_chunk=self.if_chunk,
            unroll=self.unroll)

        out = pl.pallas_call(
            kernel,
            out_shape=jax.ShapeDtypeStruct((b_pad, self.o_pads[-1]), jnp.float32),
            grid=grid,
            in_specs=in_specs,
            out_specs=out_specs,
            compiler_params=pltpu.CompilerParams(
                dimension_semantics=("parallel",),   # megacore on v7x
                vmem_limit_bytes=vmem_limit),
        )(x_pad, *w_padded)
        return out[:B, :self.o_last]

    def __call__(self, x):
        xf = jnp.asarray(x).reshape(x.shape[0], -1).astype(jnp.float32)
        return self._forward(xf, *self.w_padded)


# --------------------------- synthetic core mapping ---------------------------
class SyntheticCore:
    """Minimal stand-in for a mapped core: weight (O,A) == core_matrix.T,
    threshold, latency. Core 0's axon_sources are the flattened input neurons
    in order; core i>0 reads core i-1's output neurons in order; the last
    core's neurons are the output_sources."""

    def __init__(self, weight, threshold, latency):
        self.weight = weight
        self.threshold = float(threshold)
        self.latency = latency


def make_runner_from_cores(cores, simulation_length, thresholding_mode="<", **kw):
    """Mirrors StableSpikingCoreFlow construction (preprocessor == identity):
    cores processed in latency order, chained linearly."""
    order = sorted(range(len(cores)), key=lambda i: cores[i].latency)
    weights = [cores[i].weight for i in order]
    thetas = [cores[i].threshold for i in order]
    return CoreChainRunner(weights, thetas, simulation_length,
                           thresholding_mode, **kw)


# ------------------------------ pure-JAX reference ----------------------------
def _ref_core(spike_train, W, theta, mode):
    """Direct transcription of _process_core (f32, per-cycle matmuls)."""
    T, B, A = spike_train.shape
    O = W.shape[0]
    op = (lambda a, b: a < b) if mode == "<" else (lambda a, b: a <= b)
    mem = jnp.zeros((B, O), jnp.float32)
    avg = jnp.zeros((B, O), jnp.float32)
    for c in range(T):
        val = (W @ spike_train[c].T).T
        mem = mem + val
        avg = avg + val / T
        mem = mem - theta * op(theta, mem).astype(jnp.float32)
    m = jnp.zeros((B, O), jnp.float32)
    spikes = []
    for c in range(T):
        m = m + avg
        fired = op(theta, m).astype(jnp.float32)
        spikes.append(fired)
        m = m - theta * fired
    spikes = jnp.stack(spikes)
    return spikes, spikes.sum(0)


def reference_forward(x, cores, simulation_length, thresholding_mode="<"):
    B = x.shape[0]
    xf = x.reshape(B, -1).astype(jnp.float32)
    T = simulation_length
    s_in = jnp.broadcast_to(xf[None], (T,) + xf.shape)
    cache = {-1: s_in}
    out = None
    for t in range(max(c.latency for c in cores) + 1):
        for idx, core in enumerate(cores):
            if core.latency == t:
                spikes, osum = _ref_core(cache[idx - 1], core.weight,
                                         core.threshold, thresholding_mode)
                cache[idx] = spikes
                out = osum
    return out


# ----------------------------------- main --------------------------------------
if __name__ == "__main__":
    key = jax.random.PRNGKey(0)
    k_x, k_w0, k_w1, k_x2 = jax.random.split(key, 4)

    # input_shape = (4, 4, 4) per sample -> 64 flattened input neurons
    B, C, H, W = 2, 4, 4, 4
    D_in = C * H * W                 # 64
    O0, O1 = 32, 16
    T_SIM = 8

    x = jax.random.uniform(k_x, (B, C, H, W), dtype=jnp.float32)
    w0 = 0.3 * jax.random.normal(k_w0, (O0, D_in), dtype=jnp.float32)
    w1 = 0.5 * jax.random.normal(k_w1, (O1, O0), dtype=jnp.float32)
    cores = [SyntheticCore(w0, threshold=1.0, latency=0),
             SyntheticCore(w1, threshold=0.5, latency=1)]

    # --- Test 1: toy batch, single batch tile (grid == 1), '<' mode ----------
    runner = make_runner_from_cores(cores, T_SIM, "<")
    out = jax.block_until_ready(runner(x))
    ref = reference_forward(x, cores, T_SIM, "<")
    assert out.shape == (B, O1)
    assert np.allclose(np.asarray(out), np.asarray(ref), atol=1e-4), \
        "Pallas kernel mismatch vs reference (test 1)"

    # --- Test 2: multi-tile batch grid (forced tile=8 -> 3 tiles), '<=' mode --
    B2 = 20
    x2 = jax.random.uniform(k_x2, (B2, C, H, W), dtype=jnp.float32)
    runner2 = make_runner_from_cores(cores, T_SIM, "<=", max_batch_tile=8)
    out2 = jax.block_until_ready(runner2(x2))
    ref2 = reference_forward(x2, cores, T_SIM, "<=")
    assert out2.shape == (B2, O1)
    assert np.allclose(np.asarray(out2), np.asarray(ref2), atol=1e-4), \
        "Pallas kernel mismatch vs reference (test 2, batch grid)"

    print("KERNEL_OK")
</pallas_src>

<mosaic_0001>
module attributes {stable_mosaic.version = 11 : i64} {
  func.func @_fused_chain_kernel(%arg0: i32, %arg1: memref<8x128xf32, #tpu.memory_space<vmem>>, %arg2: memref<128x128xf32, #tpu.memory_space<vmem>>, %arg3: memref<128x128xf32, #tpu.memory_space<vmem>>, %arg4: memref<8x128xf32, #tpu.memory_space<vmem>>) attributes {dimension_semantics = [#tpu.dimension_semantics<parallel>], iteration_bounds = array<i64: 1>, scalar_prefetch = 0 : i64, scratch_operands = 0 : i64, tpu.core_type = #tpu.core_type<tc>, window_params = [{transform_indices = @transform_0, window_bounds = array<i64: 8, 128>}, {pipeline_mode = #tpu.pipeline_mode<synchronous>, transform_indices = @transform_1, window_bounds = array<i64: 128, 128>}, {pipeline_mode = #tpu.pipeline_mode<synchronous>, transform_indices = @transform_2, window_bounds = array<i64: 128, 128>}, {transform_indices = @transform_3, window_bounds = array<i64: 8, 128>}]} {
    %c0 = arith.constant 0 : index
    %c0_0 = arith.constant 0 : index
    %0 = vector.load %arg1[%c0, %c0_0] : memref<8x128xf32, #tpu.memory_space<vmem>>, vector<8x128xf32>
    %c0_1 = arith.constant 0 : index
    %c0_2 = arith.constant 0 : index
    %1 = vector.load %arg2[%c0_1, %c0_2] : memref<128x128xf32, #tpu.memory_space<vmem>>, vector<128x128xf32>
    %cst = arith.constant dense<0.000000e+00> : vector<8x128xf32>
    %2 = tpu.matmul %0, %1, %cst {dimension_numbers = #tpu.dot_dimension_numbers<[1], [0], [0], [1], [0, 0, 1, 1], [], []>} : vector<8x128xf32>, vector<128x128xf32>, vector<8x128xf32> -> vector<8x128xf32>
    %cst_3 = arith.constant 0.000000e+00 : f32
    %3 = vector.broadcast %cst_3 : f32 to vector<8x128xf32>
    %cst_4 = arith.constant 0.000000e+00 : f32
    %4 = vector.broadcast %cst_4 : f32 to vector<8x128xf32>
    %cst_5 = arith.constant 1.000000e+00 : f32
    %c0_i32 = arith.constant 0 : i32
    %5 = arith.addf %3, %2 : vector<8x128xf32>
    %6 = vector.broadcast %cst_5 : f32 to vector<8x128xf32>
    %7 = arith.cmpf olt, %6, %5 : vector<8x128xf32>
    %8 = arith.extui %7 : vector<8x128xi1> to vector<8x128xi32>
    %9 = arith.sitofp %8 : vector<8x128xi32> to vector<8x128xf32>
    %10 = vector.broadcast %cst_5 : f32 to vector<8x128xf32>
    %11 = arith.mulf %10, %9 : vector<8x128xf32>
    %12 = arith.subf %5, %11 : vector<8x128xf32>
    %13 = arith.addf %4, %9 : vector<8x128xf32>
    %c1_i32 = arith.constant 1 : i32
    %14 = arith.addf %12, %2 : vector<8x128xf32>
    %15 = vector.broadcast %cst_5 : f32 to vector<8x128xf32>
    %16 = arith.cmpf olt, %15, %14 : vector<8x128xf32>
    %17 = arith.extui %16 : vector<8x128xi1> to vector<8x128xi32>
    %18 = arith.sitofp %17 : vector<8x128xi32> to vector<8x128xf32>
    %19 = vector.broadcast %cst_5 : f32 to vector<8x128xf32>
    %20 = arith.mulf %19, %18 : vector<8x128xf32>
    %21 = arith.subf %14, %20 : vector<8x128xf32>
    %22 = arith.addf %13, %18 : vector<8x128xf32>
    %c2_i32 = arith.constant 2 : i32
    %23 = arith.addf %21, %2 : vector<8x128xf32>
    %24 = vector.broadcast %cst_5 : f32 to vector<8x128xf32>
    %25 = arith.cmpf olt, %24, %23 : vector<8x128xf32>
    %26 = arith.extui %25 : vector<8x128xi1> to vector<8x128xi32>
    %27 = arith.sitofp %26 : vector<8x128xi32> to vector<8x128xf32>
    %28 = vector.broadcast %cst_5 : f32 to vector<8x128xf32>
    %29 = arith.mulf %28, %27 : vector<8x128xf32>
    %30 = arith.subf %23, %29 : vector<8x128xf32>
    %31 = arith.addf %22, %27 : vector<8x128xf32>
    %c3_i32 = arith.constant 3 : i32
    %32 = arith.addf %30, %2 : vector<8x128xf32>
    %33 = vector.broadcast %cst_5 : f32 to vector<8x128xf32>
    %34 = arith.cmpf olt, %33, %32 : vector<8x128xf32>
    %35 = arith.extui %34 : vector<8x128xi1> to vector<8x128xi32>
    %36 = arith.sitofp %35 : vector<8x128xi32> to vector<8x128xf32>
    %37 = vector.broadcast %cst_5 : f32 to vector<8x128xf32>
    %38 = arith.mulf %37, %36 : vector<8x128xf32>
    %39 = arith.subf %32, %38 : vector<8x128xf32>
    %40 = arith.addf %31, %36 : vector<8x128xf32>
    %c4_i32 = arith.constant 4 : i32
    %41 = arith.addf %39, %2 : vector<8x128xf32>
    %42 = vector.broadcast %cst_5 : f32 to vector<8x128xf32>
    %43 = arith.cmpf olt, %42, %41 : vector<8x128xf32>
    %44 = arith.extui %43 : vector<8x128xi1> to vector<8x128xi32>
    %45 = arith.sitofp %44 : vector<8x128xi32> to vector<8x128xf32>
    %46 = vector.broadcast %cst_5 : f32 to vector<8x128xf32>
    %47 = arith.mulf %46, %45 : vector<8x128xf32>
    %48 = arith.subf %41, %47 : vector<8x128xf32>
    %49 = arith.addf %40, %45 : vector<8x128xf32>
    %c5_i32 = arith.constant 5 : i32
    %50 = arith.addf %48, %2 : vector<8x128xf32>
    %51 = vector.broadcast %cst_5 : f32 to vector<8x128xf32>
    %52 = arith.cmpf olt, %51, %50 : vector<8x128xf32>
    %53 = arith.extui %52 : vector<8x128xi1> to vector<8x128xi32>
    %54 = arith.sitofp %53 : vector<8x128xi32> to vector<8x128xf32>
    %55 = vector.broadcast %cst_5 : f32 to vector<8x128xf32>
    %56 = arith.mulf %55, %54 : vector<8x128xf32>
    %57 = arith.subf %50, %56 : vector<8x128xf32>
    %58 = arith.addf %49, %54 : vector<8x128xf32>
    %c6_i32 = arith.constant 6 : i32
    %59 = arith.addf %57, %2 : vector<8x128xf32>
    %60 = vector.broadcast %cst_5 : f32 to vector<8x128xf32>
    %61 = arith.cmpf olt, %60, %59 : vector<8x128xf32>
    %62 = arith.extui %61 : vector<8x128xi1> to vector<8x128xi32>
    %63 = arith.sitofp %62 : vector<8x128xi32> to vector<8x128xf32>
    %64 = vector.broadcast %cst_5 : f32 to vector<8x128xf32>
    %65 = arith.mulf %64, %63 : vector<8x128xf32>
    %66 = arith.subf %59, %65 : vector<8x128xf32>
    %67 = arith.addf %58, %63 : vector<8x128xf32>
    %c7_i32 = arith.constant 7 : i32
    %68 = arith.addf %66, %2 : vector<8x128xf32>
    %69 = vector.broadcast %cst_5 : f32 to vector<8x128xf32>
    %70 = arith.cmpf olt, %69, %68 : vector<8x128xf32>
    %71 = arith.extui %70 : vector<8x128xi1> to vector<8x128xi32>
    %72 = arith.sitofp %71 : vector<8x128xi32> to vector<8x128xf32>
    %73 = vector.broadcast %cst_5 : f32 to vector<8x128xf32>
    %74 = arith.mulf %73, %72 : vector<8x128xf32>
    %75 = arith.subf %68, %74 : vector<8x128xf32>
    %76 = arith.addf %67, %72 : vector<8x128xf32>
    %cst_6 = arith.constant 1.250000e-01 : f32
    %77 = vector.broadcast %cst_6 : f32 to vector<8x128xf32>
    %78 = arith.mulf %76, %77 : vector<8x128xf32>
    %c0_7 = arith.constant 0 : index
    %c0_8 = arith.constant 0 : index
    %79 = vector.load %arg3[%c0_7, %c0_8] : memref<128x128xf32, #tpu.memory_space<vmem>>, vector<128x128xf32>
    %cst_9 = arith.constant dense<0.000000e+00> : vector<8x128xf32>
    %80 = tpu.matmul %78, %79, %cst_9 {dimension_numbers = #tpu.dot_dimension_numbers<[1], [0], [0], [1], [0, 0, 1, 1], [], []>} : vector<8x128xf32>, vector<128x128xf32>, vector<8x128xf32> -> vector<8x128xf32>
    %cst_10 = arith.constant 0.000000e+00 : f32
    %81 = vector.broadcast %cst_10 : f32 to vector<8x128xf32>
    %cst_11 = arith.constant 0.000000e+00 : f32
    %82 = vector.broadcast %cst_11 : f32 to vector<8x128xf32>
    %cst_12 = arith.constant 5.000000e-01 : f32
    %c0_i32_13 = arith.constant 0 : i32
    %83 = arith.addf %81, %80 : vector<8x128xf32>
    %84 = vector.broadcast %cst_12 : f32 to vector<8x128xf32>
    %85 = arith.cmpf olt, %84, %83 : vector<8x128xf32>
    %86 = arith.extui %85 : vector<8x128xi1> to vector<8x128xi32>
    %87 = arith.sitofp %86 : vector<8x128xi32> to vector<8x128xf32>
    %88 = vector.broadcast %cst_12 : f32 to vector<8x128xf32>
    %89 = arith.mulf %88, %87 : vector<8x128xf32>
    %90 = arith.subf %83, %89 : vector<8x128xf32>
    %91 = arith.addf %82, %87 : vector<8x128xf32>
    %c1_i32_14 = arith.constant 1 : i32
    %92 = arith.addf %90, %80 : vector<8x128xf32>
    %93 = vector.broadcast %cst_12 : f32 to vector<8x128xf32>
    %94 = arith.cmpf olt, %93, %92 : vector<8x128xf32>
    %95 = arith.extui %94 : vector<8x128xi1> to vector<8x128xi32>
    %96 = arith.sitofp %95 : vector<8x128xi32> to vector<8x128xf32>
    %97 = vector.broadcast %cst_12 : f32 to vector<8x128xf32>
    %98 = arith.mulf %97, %96 : vector<8x128xf32>
    %99 = arith.subf %92, %98 : vector<8x128xf32>
    %100 = arith.addf %91, %96 : vector<8x128xf32>
    %c2_i32_15 = arith.constant 2 : i32
    %101 = arith.addf %99, %80 : vector<8x128xf32>
    %102 = vector.broadcast %cst_12 : f32 to vector<8x128xf32>
    %103 = arith.cmpf olt, %102, %101 : vector<8x128xf32>
    %104 = arith.extui %103 : vector<8x128xi1> to vector<8x128xi32>
    %105 = arith.sitofp %104 : vector<8x128xi32> to vector<8x128xf32>
    %106 = vector.broadcast %cst_12 : f32 to vector<8x128xf32>
    %107 = arith.mulf %106, %105 : vector<8x128xf32>
    %108 = arith.subf %101, %107 : vector<8x128xf32>
    %109 = arith.addf %100, %105 : vector<8x128xf32>
    %c3_i32_16 = arith.constant 3 : i32
    %110 = arith.addf %108, %80 : vector<8x128xf32>
    %111 = vector.broadcast %cst_12 : f32 to vector<8x128xf32>
    %112 = arith.cmpf olt, %111, %110 : vector<8x128xf32>
    %113 = arith.extui %112 : vector<8x128xi1> to vector<8x128xi32>
    %114 = arith.sitofp %113 : vector<8x128xi32> to vector<8x128xf32>
    %115 = vector.broadcast %cst_12 : f32 to vector<8x128xf32>
    %116 = arith.mulf %115, %114 : vector<8x128xf32>
    %117 = arith.subf %110, %116 : vector<8x128xf32>
    %118 = arith.addf %109, %114 : vector<8x128xf32>
    %c4_i32_17 = arith.constant 4 : i32
    %119 = arith.addf %117, %80 : vector<8x128xf32>
    %120 = vector.broadcast %cst_12 : f32 to vector<8x128xf32>
    %121 = arith.cmpf olt, %120, %119 : vector<8x128xf32>
    %122 = arith.extui %121 : vector<8x128xi1> to vector<8x128xi32>
    %123 = arith.sitofp %122 : vector<8x128xi32> to vector<8x128xf32>
    %124 = vector.broadcast %cst_12 : f32 to vector<8x128xf32>
    %125 = arith.mulf %124, %123 : vector<8x128xf32>
    %126 = arith.subf %119, %125 : vector<8x128xf32>
    %127 = arith.addf %118, %123 : vector<8x128xf32>
    %c5_i32_18 = arith.constant 5 : i32
    %128 = arith.addf %126, %80 : vector<8x128xf32>
    %129 = vector.broadcast %cst_12 : f32 to vector<8x128xf32>
    %130 = arith.cmpf olt, %129, %128 : vector<8x128xf32>
    %131 = arith.extui %130 : vector<8x128xi1> to vector<8x128xi32>
    %132 = arith.sitofp %131 : vector<8x128xi32> to vector<8x128xf32>
    %133 = vector.broadcast %cst_12 : f32 to vector<8x128xf32>
    %134 = arith.mulf %133, %132 : vector<8x128xf32>
    %135 = arith.subf %128, %134 : vector<8x128xf32>
    %136 = arith.addf %127, %132 : vector<8x128xf32>
    %c6_i32_19 = arith.constant 6 : i32
    %137 = arith.addf %135, %80 : vector<8x128xf32>
    %138 = vector.broadcast %cst_12 : f32 to vector<8x128xf32>
    %139 = arith.cmpf olt, %138, %137 : vector<8x128xf32>
    %140 = arith.extui %139 : vector<8x128xi1> to vector<8x128xi32>
    %141 = arith.sitofp %140 : vector<8x128xi32> to vector<8x128xf32>
    %142 = vector.broadcast %cst_12 : f32 to vector<8x128xf32>
    %143 = arith.mulf %142, %141 : vector<8x128xf32>
    %144 = arith.subf %137, %143 : vector<8x128xf32>
    %145 = arith.addf %136, %141 : vector<8x128xf32>
    %c7_i32_20 = arith.constant 7 : i32
    %146 = arith.addf %144, %80 : vector<8x128xf32>
    %147 = vector.broadcast %cst_12 : f32 to vector<8x128xf32>
    %148 = arith.cmpf olt, %147, %146 : vector<8x128xf32>
    %149 = arith.extui %148 : vector<8x128xi1> to vector<8x128xi32>
    %150 = arith.sitofp %149 : vector<8x128xi32> to vector<8x128xf32>
    %151 = vector.broadcast %cst_12 : f32 to vector<8x128xf32>
    %152 = arith.mulf %151, %150 : vector<8x128xf32>
    %153 = arith.subf %146, %152 : vector<8x128xf32>
    %154 = arith.addf %145, %150 : vector<8x128xf32>
    %c0_21 = arith.constant 0 : index
    %c0_22 = arith.constant 0 : index
    %155 = vector.load %arg4[%c0_21, %c0_22] : memref<8x128xf32, #tpu.memory_space<vmem>>, vector<8x128xf32>
    tpu.vector_store %arg4[%c0_21, %c0_22], %154 {strides = array<i32>} : memref<8x128xf32, #tpu.memory_space<vmem>>, vector<8x128xf32>,
    return
  }
  func.func @transform_0(%arg0: i32) -> (i32, i32) {
    %c0_i32 = arith.constant 0 : i32
    %c0_i32_0 = arith.constant 0 : i32
    return %arg0, %c0_i32 : i32, i32
  }
  func.func @transform_1(%arg0: i32) -> (i32, i32) {
    %c0_i32 = arith.constant 0 : i32
    %c0_i32_0 = arith.constant 0 : i32
    %c0_i32_1 = arith.constant 0 : i32
    return %c0_i32, %c0_i32_0 : i32, i32
  }
  func.func @transform_2(%arg0: i32) -> (i32, i32) {
    %c0_i32 = arith.constant 0 : i32
    %c0_i32_0 = arith.constant 0 : i32
    %c0_i32_1 = arith.constant 0 : i32
    return %c0_i32, %c0_i32_0 : i32, i32
  }
  func.func @transform_3(%arg0: i32) -> (i32, i32) {
    %c0_i32 = arith.constant 0 : i32
    %c0_i32_0 = arith.constant 0 : i32
    return %arg0, %c0_i32 : i32, i32
  }
}

</mosaic_0001>

<bundles_post_ra>
// kernel: _forward_impl.1
= control target key start
LH: loop header
LB: loop body
LE: loop exit
PB: predicated region body
PF: predicated region fallthrough
CT: control target
= control target key end

     0   :  { %8 = vsyncpa [#allocation3], 0  ;;  %s654_s0 = inlined_call_operand.vmem [shape: f32[8,128], index: 0, kind: input, shape index: {}]   ;;  %s655_s1 = inlined_call_operand.hbm [shape: f32[128,128], index: 1, kind: input, shape index: {}]   ;;  %s656_s2 = inlined_call_operand.hbm [shape: f32[128,128], index: 2, kind: input, shape index: {}]   ;;  %s657_s3 = inlined_call_operand.vmem [shape: f32[8,128], index: 3, kind: output, shape index: {}]  }
   0x1   :  { %9 = vsyncpa [#allocation5], 0  ;;  %s563_s12 = smov [#allocation2]   ;;  %s515_s16 = scalar_lea.hbm %s655_s1, 2048 }
   0x2   :  { %s17_s13 = sshll.u32 %s563_s12, 4  ;;  %p516_p0 = scmp.ne.s32.totalorder %s655_s1, %s515_s16  ;;  %s18_s13 = int_to_ptr.vmem [resolvable:$true] %s17_s13 }
   0x3   :  { %p519_p1 = scmp.lt.u32.totalorder %s515_s16, %s655_s1 }
   0x5   :  { %p521_p2 = pnand %p519_p1, %p516_p0 }
   0x7   :  { %524 = shalt.err (!%p521_p2)
}
   0x8   :  { %s525_s21 = scalar_lea.vmem %s18_s13, 2048  ;;  %p530_p4 = scmp.lt.s32.totalorder %s18_s13, %s18_s13 }
   0x9   :  { %p526_p3 = scmp.ne.s32.totalorder %s18_s13, %s525_s21  ;;  %p531_p5 = scmp.lt.s32.totalorder %s525_s21, %s525_s21 }
   0xb   :  { %p532_p6 = por %p531_p5, %p530_p4 }
   0xd   :  { %p533_p7 = pnand %p532_p6, %p526_p3 }
   0xf   :  { %536 = shalt.err (!%p533_p7)
}
  0x10   :  { %s564_s22 = smov 128   ;;  %s565_s23 = smov 8  }
  0x11   :  { %23 = dma.hbm_to_vmem [thread:$0]  %s655_s1, 2048, %s18_s13, [#allocation3], %s564_s22, %s564_s22, %s565_s23  }
  0x12   :  { %s566_s26 = smov [#allocation4]   ;;  %s537_s30 = scalar_lea.hbm %s656_s2, 2048 }
  0x13   :  { %s29_s27 = sshll.u32 %s566_s26, 4  ;;  %p538_p8 = scmp.ne.s32.totalorder %s656_s2, %s537_s30  ;;  %s30_s27 = int_to_ptr.vmem [resolvable:$true] %s29_s27 }
  0x14   :  { %p541_p9 = scmp.lt.u32.totalorder %s537_s30, %s656_s2 }
  0x16   :  { %p543_p10 = pnand %p541_p9, %p538_p8 }
  0x18   :  { %546 = shalt.err (!%p543_p10)
}
  0x19   :  { %s547_s8 = scalar_lea.vmem %s30_s27, 2048  ;;  %p552_p12 = scmp.lt.s32.totalorder %s30_s27, %s30_s27 }
  0x1a   :  { %p548_p11 = scmp.ne.s32.totalorder %s30_s27, %s547_s8  ;;  %p553_p13 = scmp.lt.s32.totalorder %s547_s8, %s547_s8 }
  0x1c   :  { %p554_p0 = por %p553_p13, %p552_p12 }
  0x1e   :  { %p555_p1 = pnand %p554_p0, %p548_p11 }
  0x20   :  { %558 = shalt.err (!%p555_p1)
}
  0x21   :  { %35 = dma.hbm_to_vmem [thread:$0]  %s656_s2, 2048, %s30_s27, [#allocation5], %s564_s22, %s564_s22, %s565_s23  }
  0x22   :  { %559 = dma.done.wait [#allocation3], 2048  }
  0x23   :  { %560 = vsyncadd [#allocation3], 4294965248 }
  0x24   :  { %561 = dma.done.wait [#allocation5], 2048  }
  0x25   :  { %562 = vsyncadd [#allocation5], 4294965248  ;;  %v567_v0 = vmov 0.0|0.0   ;;  %vm568_vm0 = vmmov 0   ;;  %v569_v1 = vmov 0.0   ;;  %v43_v2 = vld [vmem:[#allocation2] sm:$0xff] }
  0x26   :  { %460 = vmatprep.subr.bf16.mxu0 %v567_v0  ;;  %422 = vmatprep.mubr.msk.f32.mxu0 %vm568_vm0, %v569_v1  ;;  %v44_v3 = vld [vmem:[#allocation2 + $0x8] sm:$0xff]  ;;  %v45_v4 = vld [vmem:[#allocation2 + $0x10] sm:$0xff]  ;;  %v46_v6 = vld [vmem:[#allocation2 + $0x18] sm:$0xff] }
  0x27   :  { %484 = vmatprep.subr.bf16.mxu1 %v567_v0  ;;  %457 = vmatprep.mubr.msk.f32.mxu1 %vm568_vm0, %v569_v1  ;;  %v461_v5 = vpack.c.bf16 %v44_v3, %v43_v2  ;;  %v464_v7 = vpack.c.bf16 %v46_v6, %v45_v4  ;;  %v47_v8 = vld [vmem:[#allocation2 + $0x20] sm:$0xff]  ;;  %v48_v9 = vld [vmem:[#allocation2 + $0x28] sm:$0xff]  ;;  %v49_v11 = vld [vmem:[#allocation2 + $0x30] sm:$0xff] }
  0x28   :  { %v467_v10 = vpack.c.bf16 %v48_v9, %v47_v8  ;;  %v50_v12 = vld [vmem:[#allocation2 + $0x38] sm:$0xff]  ;;  %v51_v14 = vld [vmem:[#allocation2 + $0x40] sm:$0xff]  ;;  %v52_v15 = vld [vmem:[#allocation2 + $0x48] sm:$0xff] }
  0x29   :  { %462 = vmatpush3.bf16.msra.mxu0 %v461_v5  ;;  %v470_v13 = vpack.c.bf16 %v50_v12, %v49_v11  ;;  %v473_v16 = vpack.c.bf16 %v52_v15, %v51_v14  ;;  %v53_v17 = vld [vmem:[#allocation2 + $0x50] sm:$0xff]  ;;  %v54_v18 = vld [vmem:[#allocation2 + $0x58] sm:$0xff]  ;;  %v55_v20 = vld [vmem:[#allocation2 + $0x60] sm:$0xff] }
  0x2a   :  { %463 = vmatprep.subr.bf16.mxu0 %v567_v0  ;;  %v476_v19 = vpack.c.bf16 %v54_v18, %v53_v17  ;;  %v56_v21 = vld [vmem:[#allocation2 + $0x68] sm:$0xff]  ;;  %v57_v23 = vld [vmem:[#allocation2 + $0x70] sm:$0xff]  ;;  %v58_v24 = vld [vmem:[#allocation2 + $0x78] sm:$0xff] }
  0x2b   :  { %v479_v22 = vpack.c.bf16 %v56_v21, %v55_v20  ;;  %v482_v25 = vpack.c.bf16 %v58_v24, %v57_v23  ;;  %v42_v26 = vld [vmem:[%s654_s0] sm:$0xff]  ;;  %v178_v28 = vld [vmem:[#allocation4 + $0x8] sm:$0xff]  ;;  %v179_v29 = vld [vmem:[#allocation4 + $0x10] sm:$0xff] }
  0x2c   :  { %v177_v27 = vld [vmem:[#allocation4] sm:$0xff]  ;;  %v180_v31 = vld [vmem:[#allocation4 + $0x18] sm:$0xff]  ;;  %v182_v34 = vld [vmem:[#allocation4 + $0x28] sm:$0xff] }
  0x2d   :  { %465 = vmatpush3.bf16.msra.mxu0 %v464_v7  ;;  %v485_v30 = vpack.c.bf16 %v178_v28, %v177_v27  ;;  %v488_v32 = vpack.c.bf16 %v180_v31, %v179_v29  ;;  %v181_v33 = vld [vmem:[#allocation4 + $0x20] sm:$0xff]  ;;  %v183_v36 = vld [vmem:[#allocation4 + $0x30] sm:$0xff]  ;;  %v184_v37 = vld [vmem:[#allocation4 + $0x38] sm:$0xff] }
  0x2e   :  { %466 = vmatprep.subr.bf16.mxu0 %v567_v0  ;;  %v491_v35 = vpack.c.bf16 %v182_v34, %v181_v33  ;;  %v494_v38 = vpack.c.bf16 %v184_v37, %v183_v36  ;;  %v185_v39 = vld [vmem:[#allocation4 + $0x40] sm:$0xff]  ;;  %v186_v40 = vld [vmem:[#allocation4 + $0x48] sm:$0xff]  ;;  %v187_v42 = vld [vmem:[#allocation4 + $0x50] sm:$0xff] }
  0x2f   :  { %486 = vmatpush3.bf16.msra.mxu1 %v485_v30  ;;  %v497_v41 = vpack.c.bf16 %v186_v40, %v185_v39  ;;  %v188_v43 = vld [vmem:[#allocation4 + $0x58] sm:$0xff]  ;;  %v189_v45 = vld [vmem:[#allocation4 + $0x60] sm:$0xff]  ;;  %v190_v46 = vld [vmem:[#allocation4 + $0x68] sm:$0xff] }
  0x30   :  { %487 = vmatprep.subr.bf16.mxu1 %v567_v0  ;;  %v500_v44 = vpack.c.bf16 %v188_v43, %v187_v42  ;;  %v503_v47 = vpack.c.bf16 %v190_v46, %v189_v45  ;;  %v191_v48 = vld [vmem:[#allocation4 + $0x70] sm:$0xff]  ;;  %v192_v49 = vld [vmem:[#allocation4 + $0x78] sm:$0xff] }
  0x31   :  { %468 = vmatpush3.bf16.msra.mxu0 %v467_v10  ;;  %v506_v50 = vpack.c.bf16 %v192_v49, %v191_v48 }
  0x32   :  { %469 = vmatprep.subr.bf16.mxu0 %v567_v0 }
  0x33   :  { %489 = vmatpush3.bf16.msra.mxu1 %v488_v32 }
  0x34   :  { %490 = vmatprep.subr.bf16.mxu1 %v567_v0 }
  0x35   :  { %471 = vmatpush3.bf16.msra.mxu0 %v470_v13 }
  0x36   :  { %472 = vmatprep.subr.bf16.mxu0 %v567_v0 }
  0x37   :  { %492 = vmatpush3.bf16.msra.mxu1 %v491_v35 }
  0x38   :  { %493 = vmatprep.subr.bf16.mxu1 %v567_v0 }
  0x39   :  { %474 = vmatpush3.bf16.msra.mxu0 %v473_v16 }
  0x3a   :  { %475 = vmatprep.subr.bf16.mxu0 %v567_v0 }
  0x3b   :  { %495 = vmatpush3.bf16.msra.mxu1 %v494_v38 }
  0x3c   :  { %496 = vmatprep.subr.bf16.mxu1 %v567_v0 }
  0x3d   :  { %477 = vmatpush3.bf16.msra.mxu0 %v476_v19 }
  0x3e   :  { %478 = vmatprep.subr.bf16.mxu0 %v567_v0 }
  0x3f   :  { %498 = vmatpush3.bf16.msra.mxu1 %v497_v41 }
  0x40   :  { %499 = vmatprep.subr.bf16.mxu1 %v567_v0 }
  0x41   :  { %480 = vmatpush3.bf16.msra.mxu0 %v479_v22 }
  0x42   :  { %481 = vmatprep.subr.bf16.mxu0 %v567_v0 }
  0x43   :  { %501 = vmatpush3.bf16.msra.mxu1 %v500_v44 }
  0x44   :  { %502 = vmatprep.subr.bf16.mxu1 %v567_v0 }
  0x45   :  { %483 = vmatpush3.bf16.msra.mxu0 %v482_v25 }
  0x47   :  { %504 = vmatpush3.bf16.msra.mxu1 %v503_v47 }
  0x48   :  { %423 = vmatmul.mubr.f32.vlgmr.msra.gmra.mrb[0].mxu0 %v42_v26  ;;  %505 = vmatprep.subr.bf16.mxu1 %v567_v0 }
  0x4b   :  { %507 = vmatpush3.bf16.msra.mxu1 %v506_v50 }
 0x11b   :  { %v125_v51 = vpop.f32.mrb[0].mxu0 }
 0x11c   :  { %v424_v52 = vpop.f32.mrb[1].mxu0  ;;  %vm324_vm1 = vcmp.gt.f32.partialorder %v125_v51, 1.0 }
 0x11d   :  { %v325_v53 = vsel %vm324_vm1, 1.0, %v569_v1 }
 0x11e   :  { %v133_v54 = vsub.f32 %v125_v51, %v325_v53 }
 0x120   :  { %v135_v55 = vadd.f32 %v133_v54, %v125_v51 }
 0x122   :  { %vm326_vm2 = vcmp.gt.f32.partialorder %v135_v55, 1.0 }
 0x123   :  { %v327_v56 = vsel %vm326_vm2, 1.0, %v569_v1 }
 0x124   :  { %v139_v57 = vsub.f32 %v135_v55, %v327_v56  ;;  %v140_v6 = vadd.f32 %v327_v56, %v325_v53 }
 0x126   :  { %v141_v58 = vadd.f32 %v139_v57, %v125_v51 }
 0x128   :  { %vm328_vm3 = vcmp.gt.f32.partialorder %v141_v58, 1.0 }
 0x129   :  { %v329_v59 = vsel %vm328_vm3, 1.0, %v569_v1 }
 0x12a   :  { %v145_v60 = vsub.f32 %v141_v58, %v329_v59  ;;  %v146_v8 = vadd.f32 %v329_v59, %v140_v6 }
 0x12c   :  { %v147_v61 = vadd.f32 %v145_v60, %v125_v51 }
 0x12e   :  { %vm330_vm4 = vcmp.gt.f32.partialorder %v147_v61, 1.0 }
 0x12f   :  { %v331_v62 = vsel %vm330_vm4, 1.0, %v569_v1 }
 0x130   :  { %v151_v63 = vsub.f32 %v147_v61, %v331_v62  ;;  %v152_v10 = vadd.f32 %v331_v62, %v146_v8 }
 0x132   :  { %v153_v0 = vadd.f32 %v151_v63, %v125_v51 }
 0x134   :  { %vm332_vm5 = vcmp.gt.f32.partialorder %v153_v0, 1.0 }
 0x135   :  { %v333_v2 = vsel %vm332_vm5, 1.0, %v569_v1 }
 0x136   :  { %v157_v3 = vsub.f32 %v153_v0, %v333_v2  ;;  %v158_v12 = vadd.f32 %v333_v2, %v152_v10 }
 0x138   :  { %v159_v4 = vadd.f32 %v157_v3, %v125_v51 }
 0x13a   :  { %vm334_vm6 = vcmp.gt.f32.partialorder %v159_v4, 1.0 }
 0x13b   :  { %v335_v5 = vsel %vm334_vm6, 1.0, %v569_v1 }
 0x13c   :  { %v163_v7 = vsub.f32 %v159_v4, %v335_v5  ;;  %v164_v14 = vadd.f32 %v335_v5, %v158_v12 }
 0x13e   :  { %v165_v9 = vadd.f32 %v163_v7, %v125_v51 }
 0x140   :  { %vm336_vm7 = vcmp.gt.f32.partialorder %v165_v9, 1.0 }
 0x141   :  { %v337_v11 = vsel %vm336_vm7, 1.0, %v569_v1 }
 0x142   :  { %v169_v13 = vsub.f32 %v165_v9, %v337_v11  ;;  %v170_v16 = vadd.f32 %v337_v11, %v164_v14 }
 0x144   :  { %v171_v15 = vadd.f32 %v169_v13, %v125_v51 }
 0x146   :  { %vm338_vm8 = vcmp.gt.f32.partialorder %v171_v15, 1.0 }
 0x147   :  { %v339_v17 = vsel %vm338_vm8, 1.0, %v569_v1 }
 0x148   :  { %v175_v18 = vadd.f32 %v339_v17, %v170_v16 }
 0x14a   :  { %v176_v19 = vmul.f32 0.125, %v175_v18 }
 0x14c   :  { %458 = vmatmul.mubr.f32.vlgmr.msra.gmra.mrb[0].mxu1 %v176_v19 }
 0x21f   :  { %v259_v20 = vpop.f32.mrb[0].mxu1 }
 0x220   :  { %vm340_vm9 = vcmp.gt.f32.partialorder %v259_v20, 0.5  ;;  %v459_v21 = vpop.f32.mrb[1].mxu1 }
 0x221   :  { %v341_v22 = vsel %vm340_vm9, 1.0, %v569_v1 }
 0x222   :  { %v267_v23 = vmul.f32 0.5, %v341_v22 }
 0x224   :  { %v268_v24 = vsub.f32 %v259_v20, %v267_v23 }
 0x226   :  { %v270_v25 = vadd.f32 %v268_v24, %v259_v20 }
 0x228   :  { %vm342_vm10 = vcmp.gt.f32.partialorder %v270_v25, 0.5 }
 0x229   :  { %v343_v26 = vsel %vm342_vm10, 1.0, %v569_v1 }
 0x22a   :  { %v274_v27 = vmul.f32 0.5, %v343_v26  ;;  %v276_v45 = vadd.f32 %v343_v26, %v341_v22 }
 0x22c   :  { %v275_v28 = vsub.f32 %v270_v25, %v274_v27 }
 0x22e   :  { %v277_v29 = vadd.f32 %v275_v28, %v259_v20 }
 0x230   :  { %vm344_vm11 = vcmp.gt.f32.partialorder %v277_v29, 0.5 }
 0x231   :  { %v345_v30 = vsel %vm344_vm11, 1.0, %v569_v1 }
 0x232   :  { %v281_v31 = vmul.f32 0.5, %v345_v30  ;;  %v283_v47 = vadd.f32 %v345_v30, %v276_v45 }
 0x234   :  { %v282_v32 = vsub.f32 %v277_v29, %v281_v31 }
 0x236   :  { %v284_v33 = vadd.f32 %v282_v32, %v259_v20 }
 0x238   :  { %vm346_vm12 = vcmp.gt.f32.partialorder %v284_v33, 0.5 }
 0x239   :  { %v347_v34 = vsel %vm346_vm12, 1.0, %v569_v1 }
 0x23a   :  { %v288_v35 = vmul.f32 0.5, %v347_v34  ;;  %v290_v49 = vadd.f32 %v347_v34, %v283_v47 }
 0x23c   :  { %v289_v36 = vsub.f32 %v284_v33, %v288_v35 }
 0x23e   :  { %v291_v37 = vadd.f32 %v289_v36, %v259_v20 }
 0x240   :  { %vm348_vm13 = vcmp.gt.f32.partialorder %v291_v37, 0.5 }
 0x241   :  { %v349_v38 = vsel %vm348_vm13, 1.0, %v569_v1 }
 0x242   :  { %v295_v39 = vmul.f32 0.5, %v349_v38  ;;  %v297_v51 = vadd.f32 %v349_v38, %v290_v49 }
 0x244   :  { %v296_v40 = vsub.f32 %v291_v37, %v295_v39 }
 0x246   :  { %v298_v41 = vadd.f32 %v296_v40, %v259_v20 }
 0x248   :  { %vm350_vm14 = vcmp.gt.f32.partialorder %v298_v41, 0.5 }
 0x249   :  { %v351_v42 = vsel %vm350_vm14, 1.0, %v569_v1 }
 0x24a   :  { %v302_v43 = vmul.f32 0.5, %v351_v42  ;;  %v304_v53 = vadd.f32 %v351_v42, %v297_v51 }
 0x24c   :  { %v303_v44 = vsub.f32 %v298_v41, %v302_v43 }
 0x24e   :  { %v305_v46 = vadd.f32 %v303_v44, %v259_v20 }
 0x250   :  { %vm352_vm15 = vcmp.gt.f32.partialorder %v305_v46, 0.5 }
 0x251   :  { %v353_v48 = vsel %vm352_vm15, 1.0, %v569_v1 }
 0x252   :  { %v309_v50 = vmul.f32 0.5, %v353_v48  ;;  %v311_v55 = vadd.f32 %v353_v48, %v304_v53 }
 0x254   :  { %v310_v52 = vsub.f32 %v305_v46, %v309_v50 }
 0x256   :  { %v312_v54 = vadd.f32 %v310_v52, %v259_v20 }
 0x258   :  { %vm354_vm0 = vcmp.gt.f32.partialorder %v312_v54, 0.5 }
 0x259   :  { %v355_v56 = vsel %vm354_vm0, 1.0, %v569_v1 }
 0x25a   :  { %v316_v57 = vadd.f32 %v355_v56, %v311_v55 }
 0x25c   :  { %317 = vst [vmem:[%s657_s3] sm:$0xff] %v316_v57 }
 0x25d   :  { %322 = vsyncpa [#allocation3], 1 }
 0x25e   :  { %323 = vsyncpa [#allocation5], 1 }

</bundles_post_ra>
